<compile_context>
chip_gen: v5e
topology: v5e:2x2
jax: 0.10.0
libtpu: 0.0.40
codegen_flags: <defaults>
</compile_context>

<pallas_src>
import math
import functools

import jax
import jax.numpy as jnp
from jax import lax
from jax.experimental import pallas as pl
from jax.experimental.pallas import tpu as pltpu

# ----------------------------- config -----------------------------
B = 2            # batch
T = 8            # sequence length (== block_size); power of two (bitwise block mask)
C = 32           # n_embd
N_HEAD = 4
HEAD_DIM = C // N_HEAD
LN_EPS = 1e-5


# ----------------------------- kernel -----------------------------
def fused_blocks_kernel(x_ref, wqk_ref, prm_ref, bqk_ref, o_ref, *, T, H, L):
    """Single grid-less invocation: L x (LayerNorm + fused QK projection + merged-head
    causal attention + identity output projection (bias only) + residual) over all
    B*T rows at once."""
    R = x_ref.shape[0]                 # B*T flattened rows
    C = x_ref.shape[1]
    hd = C // H
    S = H * R                          # head-stacked rows (row = h*R + b*T + t)
    scale = 1.0 / math.sqrt(hd)

    # Block-diagonal (same batch & head) + causal additive bias.  Shared by every
    # layer, so built once outside the layer loop.  T is a power of two, so only
    # bitwise AND + compares are needed (no int div/mod).
    i = lax.broadcasted_iota(jnp.int32, (S, S), 0)
    j = lax.broadcasted_iota(jnp.int32, (S, S), 1)
    same_blk = (i & ~(T - 1)) == (j & ~(T - 1))
    causal = (j & (T - 1)) <= (i & (T - 1))
    bias = jnp.where(same_blk & causal, jnp.float32(0.0), jnp.float32(-1e30))

    x = x_ref[...]                                     # (R, C) f32 residual stream

    for l in range(L):                                 # static unroll: all layers, one call
        p = prm_ref[l]                                 # (3, C): [ln_w, ln_b, b_proj]
        ln_w = p[0:1, :]
        ln_b = p[1:2, :]
        b_proj = p[2:3, :]                             # IdentityProjection bias (trainable)
        b_qk = bqk_ref[l]                              # (1, 2C) fused [b_q | b_k]

        # ---- LayerNorm (biased variance, eps inside rsqrt, affine) -- f32 VPU ----
        mean = jnp.mean(x, axis=-1, keepdims=True)
        cen = x - mean
        var = jnp.mean(cen * cen, axis=-1, keepdims=True)
        xn = cen * lax.rsqrt(var + LN_EPS) * ln_w + ln_b            # (R, C)

        # ---- fused QK projection (identity-V: V = xn, V columns sliced off in wrapper)
        #      bf16 MXU operands, f32 accumulation; single fused bias add ----
        qk = jnp.dot(xn.astype(jnp.bfloat16), wqk_ref[l],
                     preferred_element_type=jnp.float32) + b_qk     # (R, 2C)

        # ---- stack heads along the sublane axis -> (S, hd); one MXU pair total ----
        qs = jnp.concatenate([qk[:, h * hd:(h + 1) * hd] for h in range(H)], axis=0)
        ks = jnp.concatenate([qk[:, C + h * hd:C + (h + 1) * hd] for h in range(H)], axis=0)
        vs = jnp.concatenate([xn[:, h * hd:(h + 1) * hd] for h in range(H)], axis=0)

        # ---- merged scaled-dot-product attention (scale folded into q pre-cast) ----
        s = lax.dot_general((qs * scale).astype(jnp.bfloat16),
                            ks.astype(jnp.bfloat16),
                            (((1,), (1,)), ((), ())),               # qs @ ks^T  (S, S)
                            preferred_element_type=jnp.float32) + bias
        m = jnp.max(s, axis=-1, keepdims=True)
        pexp = jnp.exp(s - m)
        lsum = jnp.sum(pexp, axis=-1, keepdims=True)
        r = pl.reciprocal(lsum, approx=True)           # EUP slot
        r = r * (2.0 - lsum * r)                       # one Newton step -> f32 accuracy
        # Deferred normalization: scale the (S, hd) result, not the (S, S) probs.
        # PV matmul stays f32 (precision of the identity-V / residual path).
        ys = jnp.dot(pexp, vs, preferred_element_type=jnp.float32) * r      # (S, hd)

        # ---- un-stack heads back onto the lane axis -> single full-width add/store ----
        y = jnp.concatenate([ys[h * R:(h + 1) * R, :] for h in range(H)], axis=1)  # (R, C)

        # ---- identity output projection: eye weight skipped, bias only + residual ----
        x = x + y + b_proj

    o_ref[...] = x.astype(o_ref.dtype)                 # one (R, C) store


# ----------------------------- wrapper -----------------------------
def blocks_forward(x, ln_w, ln_b, w_qkv_t, b_qkv, b_proj, *, n_head=N_HEAD):
    """Runs L stacked blocks in ONE pallas_call.  Per-layer params carry a leading
    layer axis: ln_w/ln_b/b_proj (L, C), w_qkv_t (L, C, 3C), b_qkv (L, 3C)."""
    b, t, c = x.shape
    L = w_qkv_t.shape[0]
    assert c % n_head == 0
    assert t & (t - 1) == 0, "bitwise block mask assumes power-of-two sequence length"

    # Static identity-V: drop the dead V third of the fused QKV weight (Mosaic will not
    # dead-code-eliminate matmul columns).  Ship as bf16: native MXU operand, half DMA.
    w_qk_t = w_qkv_t[:, :, :2 * c].astype(jnp.bfloat16)            # (L, C, 2C)
    # Tiny per-channel params folded into two small f32 operands (single copies, no grid).
    params = jnp.stack([ln_w, ln_b, b_proj], axis=1)               # (L, 3, C)
    b_qk = b_qkv[:, :2 * c].reshape(L, 1, 2 * c)                   # (L, 1, 2C) fused [b_q|b_k]
    # The IdentityProjection *weight* is never passed in: it is exploited statically.

    xf = x.reshape(b * t, c)                                       # flatten batch
    kernel = functools.partial(fused_blocks_kernel, T=t, H=n_head, L=L)

    vmem = pl.BlockSpec(memory_space=pltpu.MemorySpace.VMEM)
    out_flat = pl.pallas_call(
        kernel,
        out_shape=jax.ShapeDtypeStruct((b * t, c), x.dtype),
        # No grid: single invocation, whole-array VMEM operands, no pipeline machinery.
        in_specs=[vmem, vmem, vmem, vmem],
        out_specs=vmem,
    )(xf, w_qk_t, params, b_qk)
    return out_flat.reshape(b, t, c)


# ----------------------------- pure-JAX reference (one block) -----------------------------
def block_reference(x, ln_w, ln_b, w_qkv_t, b_qkv, b_proj, *, n_head=N_HEAD):
    b, t, c = x.shape
    hd = c // n_head
    mean = jnp.mean(x, axis=-1, keepdims=True)
    var = jnp.mean((x - mean) ** 2, axis=-1, keepdims=True)
    xn = (x - mean) / jnp.sqrt(var + LN_EPS) * ln_w + ln_b

    qkv = xn @ w_qkv_t + b_qkv
    q, k, _ = jnp.split(qkv, 3, axis=-1)
    v = xn                                            # use_identity_V

    def split_heads(z):                               # (B,T,C) -> (B,H,T,hd)
        return z.reshape(b, t, n_head, hd).transpose(0, 2, 1, 3)

    qh, kh, vh = split_heads(q), split_heads(k), split_heads(v)
    att = jnp.einsum("bhqd,bhkd->bhqk", qh, kh) / math.sqrt(hd)
    mask = jnp.tril(jnp.ones((t, t), dtype=bool))
    att = jnp.where(mask[None, None], att, -jnp.inf)
    att = jax.nn.softmax(att, axis=-1)
    y = jnp.einsum("bhqk,bhkd->bhqd", att, vh).transpose(0, 2, 1, 3).reshape(b, t, c)

    # IdentityProjection c_proj written out explicitly (eye weight + bias) to validate
    # the kernel's static shortcut.
    w_eye = jnp.eye(c, dtype=x.dtype)
    out = y @ w_eye.T + b_proj
    return out + x
    # TODO(synk): dropout layers are eval-mode no-ops (p effectively 0) and are omitted.


# ----------------------------- main -----------------------------
if __name__ == "__main__":
    key = jax.random.PRNGKey(0)
    kx, kw, kb, klw, klb, kbp = jax.random.split(key, 6)

    L = 2
    x = jax.random.normal(kx, (B, T, C), dtype=jnp.float32)

    # Per-layer params, stacked along a leading layer axis.
    ln_w = 1.0 + 0.1 * jax.random.normal(klw, (L, C), dtype=jnp.float32)
    ln_b = 0.1 * jax.random.normal(klb, (L, C), dtype=jnp.float32)
    w_qkv_t = 0.02 * jax.random.normal(kw, (L, C, 3 * C), dtype=jnp.float32)   # W_qkv^T
    b_qkv = 0.01 * jax.random.normal(kb, (L, 3 * C), dtype=jnp.float32)
    # c_proj = IdentityProjection(C, C): weight eye(C) exploited statically; bias trainable.
    b_proj = 0.01 * jax.random.normal(kbp, (L, C), dtype=jnp.float32)

    # --- L = 1: exactly the module's forward pass ---
    out1 = jax.block_until_ready(
        blocks_forward(x, ln_w[:1], ln_b[:1], w_qkv_t[:1], b_qkv[:1], b_proj[:1],
                       n_head=N_HEAD))
    ref1 = block_reference(x, ln_w[0], ln_b[0], w_qkv_t[0], b_qkv[0], b_proj[0],
                           n_head=N_HEAD)
    assert out1.shape == (B, T, C) and out1.dtype == jnp.float32
    err1 = jnp.max(jnp.abs(out1 - ref1))
    # Tolerance covers bf16 MXU operands on the Q/K path (accumulation + V/PV stay f32).
    assert jnp.allclose(out1, ref1, atol=2e-3, rtol=2e-3), f"L=1 max abs err {err1}"

    # --- L = 2: two blocks amortized into ONE pallas_call (feedback #1) ---
    out2 = jax.block_until_ready(
        blocks_forward(x, ln_w, ln_b, w_qkv_t, b_qkv, b_proj, n_head=N_HEAD))
    ref2 = block_reference(ref1, ln_w[1], ln_b[1], w_qkv_t[1], b_qkv[1], b_proj[1],
                           n_head=N_HEAD)
    err2 = jnp.max(jnp.abs(out2 - ref2))
    assert jnp.allclose(out2, ref2, atol=3e-3, rtol=3e-3), f"L=2 max abs err {err2}"

    print("KERNEL_OK")
</pallas_src>

<mosaic_0001>
module attributes {stable_mosaic.version = 11 : i64} {
  func.func @fused_blocks_kernel(%arg0: memref<16x32xf32, #tpu.memory_space<vmem>>, %arg1: memref<1x32x64xbf16, #tpu.memory_space<vmem>>, %arg2: memref<1x3x32xf32, #tpu.memory_space<vmem>>, %arg3: memref<1x1x64xf32, #tpu.memory_space<vmem>>, %arg4: memref<16x32xf32, #tpu.memory_space<vmem>>) attributes {dimension_semantics = [], scalar_prefetch = 0 : i64, scratch_operands = 0 : i64, tpu.core_type = #tpu.core_type<tc>} {
    %0 = tpu.iota {dimensions = array<i32: 0>} : vector<64x64xi32>
    %1 = tpu.iota {dimensions = array<i32: 1>} : vector<64x64xi32>
    %c-8_i32 = arith.constant -8 : i32
    %2 = vector.broadcast %c-8_i32 : i32 to vector<64x64xi32>
    %3 = arith.andi %0, %2 : vector<64x64xi32>
    %c-8_i32_0 = arith.constant -8 : i32
    %4 = vector.broadcast %c-8_i32_0 : i32 to vector<64x64xi32>
    %5 = arith.andi %1, %4 : vector<64x64xi32>
    %6 = arith.cmpi eq, %3, %5 : vector<64x64xi32>
    %c7_i32 = arith.constant 7 : i32
    %7 = vector.broadcast %c7_i32 : i32 to vector<64x64xi32>
    %8 = arith.andi %1, %7 : vector<64x64xi32>
    %c7_i32_1 = arith.constant 7 : i32
    %9 = vector.broadcast %c7_i32_1 : i32 to vector<64x64xi32>
    %10 = arith.andi %0, %9 : vector<64x64xi32>
    %11 = arith.cmpi sle, %8, %10 : vector<64x64xi32>
    %12 = arith.andi %6, %11 : vector<64x64xi1>
    %cst = arith.constant 0.000000e+00 : f32
    %cst_2 = arith.constant -1.000000e+30 : f32
    %13 = vector.broadcast %cst : f32 to vector<64x64xf32>
    %14 = vector.broadcast %cst_2 : f32 to vector<64x64xf32>
    %15 = arith.select %12, %13, %14 : vector<64x64xi1>, vector<64x64xf32>
    %c0 = arith.constant 0 : index
    %c0_3 = arith.constant 0 : index
    %16 = vector.load %arg0[%c0, %c0_3] : memref<16x32xf32, #tpu.memory_space<vmem>>, vector<16x32xf32>
    %c0_4 = arith.constant 0 : index
    %c0_5 = arith.constant 0 : index
    %c0_6 = arith.constant 0 : index
    %17 = vector.load %arg2[%c0_4, %c0_5, %c0_6] : memref<1x3x32xf32, #tpu.memory_space<vmem>>, vector<1x3x32xf32>
    %18 = vector.shape_cast %17 : vector<1x3x32xf32> to vector<3x32xf32>
    %19 = vector.extract_strided_slice %18 {offsets = [0, 0], sizes = [1, 32], strides = [1, 1]} : vector<3x32xf32> to vector<1x32xf32>
    %20 = vector.extract_strided_slice %18 {offsets = [1, 0], sizes = [1, 32], strides = [1, 1]} : vector<3x32xf32> to vector<1x32xf32>
    %21 = vector.extract_strided_slice %18 {offsets = [2, 0], sizes = [1, 32], strides = [1, 1]} : vector<3x32xf32> to vector<1x32xf32>
    %c0_7 = arith.constant 0 : index
    %c0_8 = arith.constant 0 : index
    %c0_9 = arith.constant 0 : index
    %22 = vector.load %arg3[%c0_7, %c0_8, %c0_9] : memref<1x1x64xf32, #tpu.memory_space<vmem>>, vector<1x1x64xf32>
    %23 = vector.shape_cast %22 : vector<1x1x64xf32> to vector<1x64xf32>
    %cst_10 = arith.constant dense<0.000000e+00> : vector<16xf32>
    %24 = vector.multi_reduction <add>, %16, %cst_10 [1] : vector<16x32xf32> to vector<16xf32>
    %25 = vector.shape_cast %24 : vector<16xf32> to vector<16x1xf32>
    %cst_11 = arith.constant 3.200000e+01 : f32
    %26 = vector.broadcast %cst_11 : f32 to vector<16x1xf32>
    %27 = arith.divf %25, %26 : vector<16x1xf32>
    %28 = vector.broadcast %27 : vector<16x1xf32> to vector<16x32xf32>
    %29 = arith.subf %16, %28 : vector<16x32xf32>
    %30 = arith.mulf %29, %29 : vector<16x32xf32>
    %cst_12 = arith.constant dense<0.000000e+00> : vector<16xf32>
    %31 = vector.multi_reduction <add>, %30, %cst_12 [1] : vector<16x32xf32> to vector<16xf32>
    %32 = vector.shape_cast %31 : vector<16xf32> to vector<16x1xf32>
    %cst_13 = arith.constant 3.200000e+01 : f32
    %33 = vector.broadcast %cst_13 : f32 to vector<16x1xf32>
    %34 = arith.divf %32, %33 : vector<16x1xf32>
    %cst_14 = arith.constant 9.99999974E-6 : f32
    %35 = vector.broadcast %cst_14 : f32 to vector<16x1xf32>
    %36 = arith.addf %34, %35 : vector<16x1xf32>
    %37 = math.rsqrt %36 : vector<16x1xf32>
    %38 = vector.broadcast %37 : vector<16x1xf32> to vector<16x32xf32>
    %39 = arith.mulf %29, %38 : vector<16x32xf32>
    %40 = vector.broadcast %19 : vector<1x32xf32> to vector<16x32xf32>
    %41 = arith.mulf %39, %40 : vector<16x32xf32>
    %42 = vector.broadcast %20 : vector<1x32xf32> to vector<16x32xf32>
    %43 = arith.addf %41, %42 : vector<16x32xf32>
    %44 = arith.truncf %43 : vector<16x32xf32> to vector<16x32xbf16>
    %c0_15 = arith.constant 0 : index
    %c0_16 = arith.constant 0 : index
    %c0_17 = arith.constant 0 : index
    %45 = vector.load %arg1[%c0_15, %c0_16, %c0_17] : memref<1x32x64xbf16, #tpu.memory_space<vmem>>, vector<1x32x64xbf16>
    %46 = vector.shape_cast %45 : vector<1x32x64xbf16> to vector<32x64xbf16>
    %cst_18 = arith.constant dense<0.000000e+00> : vector<16x64xf32>
    %47 = tpu.matmul %44, %46, %cst_18 {dimension_numbers = #tpu.dot_dimension_numbers<[1], [0], [0], [1], [0, 0, 1, 1], [], []>} : vector<16x32xbf16>, vector<32x64xbf16>, vector<16x64xf32> -> vector<16x64xf32>
    %48 = vector.broadcast %23 : vector<1x64xf32> to vector<16x64xf32>
    %49 = arith.addf %47, %48 : vector<16x64xf32>
    %50 = vector.extract_strided_slice %49 {offsets = [0, 0], sizes = [16, 8], strides = [1, 1]} : vector<16x64xf32> to vector<16x8xf32>
    %51 = vector.extract_strided_slice %49 {offsets = [0, 8], sizes = [16, 8], strides = [1, 1]} : vector<16x64xf32> to vector<16x8xf32>
    %52 = vector.extract_strided_slice %49 {offsets = [0, 16], sizes = [16, 8], strides = [1, 1]} : vector<16x64xf32> to vector<16x8xf32>
    %53 = vector.extract_strided_slice %49 {offsets = [0, 24], sizes = [16, 8], strides = [1, 1]} : vector<16x64xf32> to vector<16x8xf32>
    %54 = tpu.concatenate %50, %51, %52, %53 in 0 : vector<16x8xf32>, vector<16x8xf32>, vector<16x8xf32>, vector<16x8xf32> -> vector<64x8xf32>
    %55 = vector.extract_strided_slice %49 {offsets = [0, 32], sizes = [16, 8], strides = [1, 1]} : vector<16x64xf32> to vector<16x8xf32>
    %56 = vector.extract_strided_slice %49 {offsets = [0, 40], sizes = [16, 8], strides = [1, 1]} : vector<16x64xf32> to vector<16x8xf32>
    %57 = vector.extract_strided_slice %49 {offsets = [0, 48], sizes = [16, 8], strides = [1, 1]} : vector<16x64xf32> to vector<16x8xf32>
    %58 = vector.extract_strided_slice %49 {offsets = [0, 56], sizes = [16, 8], strides = [1, 1]} : vector<16x64xf32> to vector<16x8xf32>
    %59 = tpu.concatenate %55, %56, %57, %58 in 0 : vector<16x8xf32>, vector<16x8xf32>, vector<16x8xf32>, vector<16x8xf32> -> vector<64x8xf32>
    %60 = vector.extract_strided_slice %43 {offsets = [0, 0], sizes = [16, 8], strides = [1, 1]} : vector<16x32xf32> to vector<16x8xf32>
    %61 = vector.extract_strided_slice %43 {offsets = [0, 8], sizes = [16, 8], strides = [1, 1]} : vector<16x32xf32> to vector<16x8xf32>
    %62 = vector.extract_strided_slice %43 {offsets = [0, 16], sizes = [16, 8], strides = [1, 1]} : vector<16x32xf32> to vector<16x8xf32>
    %63 = vector.extract_strided_slice %43 {offsets = [0, 24], sizes = [16, 8], strides = [1, 1]} : vector<16x32xf32> to vector<16x8xf32>
    %64 = tpu.concatenate %60, %61, %62, %63 in 0 : vector<16x8xf32>, vector<16x8xf32>, vector<16x8xf32>, vector<16x8xf32> -> vector<64x8xf32>
    %cst_19 = arith.constant 0.353553385 : f32
    %65 = vector.broadcast %cst_19 : f32 to vector<64x8xf32>
    %66 = arith.mulf %54, %65 : vector<64x8xf32>
    %67 = arith.truncf %66 : vector<64x8xf32> to vector<64x8xbf16>
    %68 = arith.truncf %59 : vector<64x8xf32> to vector<64x8xbf16>
    %cst_20 = arith.constant dense<0.000000e+00> : vector<64x64xf32>
    %69 = tpu.matmul %67, %68, %cst_20 {dimension_numbers = #tpu.dot_dimension_numbers<[1], [1], [0], [0], [0, 0, 1, 0], [], []>} : vector<64x8xbf16>, vector<64x8xbf16>, vector<64x64xf32> -> vector<64x64xf32>
    %70 = arith.addf %69, %15 : vector<64x64xf32>
    %cst_21 = arith.constant dense<0xFF800000> : vector<64xf32>
    %71 = vector.multi_reduction <maximumf>, %70, %cst_21 [1] : vector<64x64xf32> to vector<64xf32>
    %72 = vector.shape_cast %71 : vector<64xf32> to vector<64x1xf32>
    %73 = vector.broadcast %72 : vector<64x1xf32> to vector<64x64xf32>
    %74 = arith.subf %70, %73 : vector<64x64xf32>
    %75 = math.exp %74 : vector<64x64xf32>
    %cst_22 = arith.constant dense<0.000000e+00> : vector<64xf32>
    %76 = vector.multi_reduction <add>, %75, %cst_22 [1] : vector<64x64xf32> to vector<64xf32>
    %77 = vector.shape_cast %76 : vector<64xf32> to vector<64x1xf32>
    %78 = tpu.reciprocal %77 {approx = true} : vector<64x1xf32> -> vector<64x1xf32>
    %79 = arith.mulf %77, %78 : vector<64x1xf32>
    %cst_23 = arith.constant 2.000000e+00 : f32
    %80 = vector.broadcast %cst_23 : f32 to vector<64x1xf32>
    %81 = arith.subf %80, %79 : vector<64x1xf32>
    %82 = arith.mulf %78, %81 : vector<64x1xf32>
    %cst_24 = arith.constant dense<0.000000e+00> : vector<64x8xf32>
    %83 = tpu.matmul %75, %64, %cst_24 {dimension_numbers = #tpu.dot_dimension_numbers<[1], [0], [0], [1], [0, 0, 1, 1], [], []>} : vector<64x64xf32>, vector<64x8xf32>, vector<64x8xf32> -> vector<64x8xf32>
    %84 = vector.broadcast %82 : vector<64x1xf32> to vector<64x8xf32>
    %85 = arith.mulf %83, %84 : vector<64x8xf32>
    %86 = vector.extract_strided_slice %85 {offsets = [0, 0], sizes = [16, 8], strides = [1, 1]} : vector<64x8xf32> to vector<16x8xf32>
    %87 = vector.extract_strided_slice %85 {offsets = [16, 0], sizes = [16, 8], strides = [1, 1]} : vector<64x8xf32> to vector<16x8xf32>
    %88 = vector.extract_strided_slice %85 {offsets = [32, 0], sizes = [16, 8], strides = [1, 1]} : vector<64x8xf32> to vector<16x8xf32>
    %89 = vector.extract_strided_slice %85 {offsets = [48, 0], sizes = [16, 8], strides = [1, 1]} : vector<64x8xf32> to vector<16x8xf32>
    %90 = tpu.concatenate %86, %87, %88, %89 in 1 : vector<16x8xf32>, vector<16x8xf32>, vector<16x8xf32>, vector<16x8xf32> -> vector<16x32xf32>
    %91 = arith.addf %16, %90 : vector<16x32xf32>
    %92 = vector.broadcast %21 : vector<1x32xf32> to vector<16x32xf32>
    %93 = arith.addf %91, %92 : vector<16x32xf32>
    %c0_25 = arith.constant 0 : index
    %c0_26 = arith.constant 0 : index
    %94 = vector.load %arg4[%c0_25, %c0_26] : memref<16x32xf32, #tpu.memory_space<vmem>>, vector<16x32xf32>
    tpu.vector_store %arg4[%c0_25, %c0_26], %93 {strides = array<i32>} : memref<16x32xf32, #tpu.memory_space<vmem>>, vector<16x32xf32>,
    return
  }
}

</mosaic_0001>

<bundles_post_ra>
// kernel: tpu_custom_call.1
= control target key start
LH: loop header
LB: loop body
LE: loop exit
PB: predicated region body
PF: predicated region fallthrough
CT: control target
= control target key end

     0   :  { %9 = vsyncpa [#allocation3], 0  ;;  %s1007_s0 = inlined_call_operand.hbm [shape: f32[16,32], index: 0, kind: input, shape index: {}]   ;;  %s1008_s1 = inlined_call_operand.hbm [shape: bf16[1,32,64], index: 1, kind: input, shape index: {}]   ;;  %s1009_s2 = inlined_call_operand.vmem [shape: f32[1,3,32], index: 2, kind: input, shape index: {}]   ;;  %s1010_s3 = inlined_call_operand.vmem [shape: f32[1,1,64], index: 3, kind: input, shape index: {}]   ;;  %s1011_s4 = inlined_call_operand.hbm [shape: f32[16,32], index: 4, kind: output, shape index: {}]  }
   0x1   :  { %10 = vsyncpa [#allocation6], 0 }
   0x2   :  { %11 = vsyncpa [#allocation4], 0  ;;  %s16_s17 = sshll.u32 %s1007_s0, 4  ;;  %s752_s18 = smov [#allocation2]   ;;  %s17_s17 = int_to_ptr.hbm [resolvable:$true] %s16_s17 }
   0x3   :  { %s18_s19 = sshll.u32 %s752_s18, 4  ;;  %s29_s22 = sshll.u32 %s1008_s1, 4  ;;  %s19_s19 = int_to_ptr.vmem [resolvable:$true] %s18_s19  ;;  %s30_s22 = int_to_ptr.hbm [resolvable:$true] %s29_s22 }
   0x4   :  { %s753_s23 = smov 128   ;;  %s754_s24 = smov 8  }
   0x5   :  { %24 = dma.hbm_to_vmem [thread:$0]  %s17_s17, 256, %s19_s19, [#allocation3], %s753_s23, %s753_s23, %s754_s24  }
   0x6   :  { %s755_s25 = smov [#allocation5]   ;;  %s756_s27 = smov 64  }
   0x7   :  { %s31_s26 = sshll.u32 %s755_s25, 4  ;;  %s757_s0 = smov 4   ;;  %s32_s26 = int_to_ptr.vmem [resolvable:$true] %s31_s26 }
   0x8   :  { %37 = dma.hbm_to_vmem [thread:$0]  %s30_s22, 256, %s32_s26, [#allocation6], %s756_s27, %s756_s27, %s757_s0  }
   0x9   :  { %746 = dma.done.wait [#allocation3], 256  }
   0xa   :  { %747 = vsyncadd [#allocation3], 4294967040 }
   0xb   :  { %748 = dma.done.wait [#allocation6], 256  }
   0xc   :  { %749 = vsyncadd [#allocation6], 4294967040  ;;  %vm116_vm0 = vcmask 261120   ;;  %v801_v0 = vld [vmem:[#allocation2] sm:$0xff]  ;;  %v805_v2 = vld [vmem:[#allocation2 + $0x8] sm:$0xff]  ;;  %v758_v4 = vmov 32.0  }
   0xd   :  { %v117_v1 = vsel %vm116_vm0, %v801_v0, 0.0  ;;  %v120_v3 = vsel %vm116_vm0, %v805_v2, 0.0  ;;  %636 = vrcp.f32 %v758_v4  ;;  %v592_v21 = vld [vmem:[#allocation5 + $0x8] sm:$0xff]  ;;  %v591_v24 = vld [vmem:[#allocation5] sm:$0xff]  ;;  %v816_v38 = vld [vmem:[%s1009_s2] sm:$0x7] }
   0xe   :  { %118 = vadd.xlane.f32.xlu0 %v117_v1  ;;  %203 = vmatpush.bf16.msra.mxu0 %v592_v21  ;;  %v168_v42 = vperm.slane %v816_v38, 0  ;;  %v171_v46 = vperm.slane %v816_v38, 1  ;;  %v635_v53 = vld [vmem:[%s1010_s3] ss:$0 sm:$0xff]  ;;  %s759_s30 = smov 112   ;;  %s760_s5 = smov 104  }
   0xf   :  { %s761_s3 = smov 120   ;;  %s762_s6 = smov 96   ;;  %vm279_vm8 = vcmask 64512   ;;  %vm333_vm15 = vcmask 523264  }
  0x10   :  { %s764_s7 = smov 16   ;;  %s765_s8 = smov 24  }
  0x11   :  { %s766_s9 = smov [#allocation7]   ;;  %s556_s13 = sshll.u32 %s1011_s4, 4  ;;  %s557_s13 = int_to_ptr.hbm [resolvable:$true] %s556_s13 }
  0x12   :  { %204 = vmatpush.bf16.msra.mxu0 %v591_v24  ;;  %s554_s10 = sshll.u32 %s766_s9, 4  ;;  %s555_s10 = int_to_ptr.vmem [resolvable:$true] %s554_s10 }
  0x13   :  { %v637_v5 = vpop.eup %636 }
  0x14   :  { %v124_v6 = vmul.f32 32.0, %v637_v5  ;;  %vm128_vm1 = vweird.f32 %v637_v5 }
  0x16   :  { %121 = vadd.xlane.f32.xlu0 %v120_v3  ;;  %v125_v7 = vsub.f32 1.0, %v124_v6 }
  0x18   :  { %v126_v8 = vmul.f32 %v637_v5, %v125_v7 }
  0x1a   :  { %v127_v9 = vadd.f32 %v637_v5, %v126_v8 }
  0x1c   :  { %v129_v10 = vsel %vm128_vm1, %v637_v5, %v127_v9 }
  0x81   :  { %v119_v11 = vpop.xlane.xlu0 %118 }
  0x82   :  { %v130_v12 = vmul.f32 %v129_v10, %v119_v11 }
  0x84   :  { %v132_v13 = vsub.f32 %v801_v0, %v130_v12 }
  0x86   :  { %v134_v14 = vmul.f32 %v132_v13, %v132_v13 }
  0x88   :  { %v136_v15 = vsel %vm116_vm0, %v134_v14, 0.0 }
  0x89   :  { %137 = vadd.xlane.f32.xlu1 %v136_v15  ;;  %v122_v16 = vpop.xlane.xlu0 %121 }
  0x8a   :  { %v131_v17 = vmul.f32 %v129_v10, %v122_v16 }
  0x8c   :  { %v133_v18 = vsub.f32 %v805_v2, %v131_v17 }
  0x8e   :  { %v135_v19 = vmul.f32 %v133_v18, %v133_v18 }
  0x90   :  { %v139_v20 = vsel %vm116_vm0, %v135_v19, 0.0 }
  0x91   :  { %140 = vadd.xlane.f32.xlu1 %v139_v20 }
  0xfc   :  { %v138_v22 = vpop.xlane.xlu1 %137 }
  0xfd   :  { %v142_v23 = vmul.f32 %v138_v22, %v129_v10 }
  0xff   :  { %v144_v25 = vadd.f32 1e-05, %v142_v23 }
 0x101   :  { %638 = vrsqrt.f32 %v144_v25  ;;  %vm152_vm3 = vweird.f32 %v144_v25 }
 0x104   :  { %v141_v26 = vpop.xlane.xlu1 %140 }
 0x105   :  { %v143_v27 = vmul.f32 %v141_v26, %v129_v10 }
 0x107   :  { %v639_v28 = vpop.eup %638  ;;  %v145_v29 = vadd.f32 1e-05, %v143_v27 }
 0x108   :  { %v147_v30 = vmul.f32 %v639_v28, %v144_v25  ;;  %vm153_vm2 = vweird.f32 %v639_v28 }
 0x109   :  { %640 = vrsqrt.f32 %v145_v29  ;;  %vm154_vm4 = vmor %vm152_vm3, %vm153_vm2  ;;  %vm162_vm6 = vweird.f32 %v145_v29 }
 0x10a   :  { %v148_v31 = vmul.f32 %v639_v28, %v147_v30 }
 0x10c   :  { %v149_v32 = vmul.f32 0.5, %v148_v31 }
 0x10e   :  { %v150_v33 = vsub.f32 1.5, %v149_v32 }
 0x10f   :  { %v641_v34 = vpop.eup %640 }
 0x110   :  { %v151_v35 = vmul.f32 %v639_v28, %v150_v33  ;;  %v157_v36 = vmul.f32 %v641_v34, %v145_v29  ;;  %vm163_vm5 = vweird.f32 %v641_v34 }
 0x111   :  { %vm164_vm7 = vmor %vm162_vm6, %vm163_vm5 }
 0x112   :  { %v158_v37 = vmul.f32 %v641_v34, %v157_v36  ;;  %v155_v39 = vsel %vm154_vm4, %v639_v28, %v151_v35  ;;  %v51_v36 = vlaneseq }
 0x113   :  { %v166_v43 = vmul.f32 %v155_v39, %v132_v13 }
 0x114   :  { %v159_v40 = vmul.f32 0.5, %v158_v37  ;;  %v52_v37 = vshrl.u32 %v51_v36, 7 }
 0x115   :  { %v169_v47 = vmul.f32 %v168_v42, %v166_v43 }
 0x116   :  { %v160_v41 = vsub.f32 1.5, %v159_v40  ;;  %v56_v39 = vadd.s32 32, %v52_v37  ;;  %v61_v40 = vand.u32 127, %v51_v36 }
 0x117   :  { %v820_v50 = vadd.f32 %v171_v46, %v169_v47 }
 0x118   :  { %v161_v44 = vmul.f32 %v641_v34, %v160_v41  ;;  %v66_v41 = vand.u32 4294967288, %v56_v39  ;;  %v865_v43 = vand.u32 4294967288, %v61_v40 }
 0x11a   :  { %v165_v45 = vsel %vm164_vm7, %v641_v34, %v161_v44  ;;  %v867_v44 = vand.u32 7, %v61_v40  ;;  %vm75_vm9 = vcmp.eq.s32.totalorder %v66_v41, %v865_v43 }
 0x11b   :  { %v167_v48 = vmul.f32 %v165_v45, %v133_v18  ;;  %v62_v45 = vand.u32 4294967288, %v52_v37 }
 0x11d   :  { %v170_v49 = vmul.f32 %v168_v42, %v167_v48  ;;  %v84_v42 = vand.u32 7, %v56_v39  ;;  %v54_v48 = vadd.s32 16, %v52_v37  ;;  %vm872_vm12 = vcmp.eq.s32.totalorder %v62_v45, %v865_v43 }
 0x11f   :  { %v822_v51 = vadd.f32 %v171_v46, %v170_v49  ;;  %vm92_vm10 = vcmp.le.s32.totalorder %v867_v44, %v84_v42  ;;  %v80_v46 = vand.u32 7, %v52_v37 }
 0x120   :  { %vm100_vm11 = vmand %vm75_vm9, %vm92_vm10 }
 0x121   :  { %v174_v52 = vpack.c.bf16 %v822_v51, %v820_v50  ;;  %v625_v62 = vpack.i.bf16 %v820_v50, %v822_v51  ;;  %vm877_vm13 = vcmp.le.s32.totalorder %v867_v44, %v80_v46 }
 0x122   :  { %vm96_vm14 = vmand %vm872_vm12, %vm877_vm13 }
 0x123   :  { %578 = vmatmul.msk.bf16.vlgmr.msra.gmra.mxu0 %vm116_vm0, %v174_v52 }
 0x1a0   :  { %v206_v54 = vpop.f32.mrf.mxu0 }
 0x1a1   :  { %v207_v55 = vadd.f32 %v635_v53, %v206_v54  ;;  %v82_v54 = vand.u32 7, %v54_v48 }
 0x1a3   :  { %219 = vrot.lane.b32.xlu0 %v207_v55, %s759_s30  ;;  %225 = vrot.lane.b32.xlu2 %v207_v55, %s760_s5  ;;  %v832_v58 = vmul.f32 0.35355338, %v207_v55  ;;  %vm896_vm2 = vcmp.le.s32.totalorder %v867_v44, %v82_v54 }
 0x1a8   :  { %v208_v56 = vpop.f32.mrf.mxu0 }
 0x1a9   :  { %v209_v57 = vadd.f32 %v635_v53, %v208_v56  ;;  %v64_v53 = vand.u32 4294967288, %v54_v48  ;;  %v57_v56 = vadd.s32 40, %v52_v37 }
 0x1ab   :  { %221 = vrot.lane.b32.xlu1 %v209_v57, %s759_s30  ;;  %227 = vrot.lane.b32.xlu2 %v209_v57, %s760_s5  ;;  %v834_v59 = vmul.f32 0.35355338, %v209_v57  ;;  %v263_v61 = vpack.c.bf16 %v209_v57, %v207_v55  ;;  %vm891_vm1 = vcmp.eq.s32.totalorder %v64_v53, %v865_v43 }
 0x1ac   :  { %vm98_vm3 = vmand %vm891_vm1, %vm896_vm2 }
 0x1ad   :  { %v259_v60 = vpack.c.bf16 %v834_v59, %v832_v58 }
 0x1b3   :  { %213 = vrot.lane.b32.xlu2 %v207_v55, %s761_s3  ;;  %271 = vrot.lane.b32.xlu1 %v263_v61, %s762_s6  ;;  %v55_v61 = vadd.s32 24, %v52_v37 }
 0x1bb   :  { %215 = vrot.lane.b32.xlu2 %v209_v57, %s761_s3  ;;  %626 = vrot.lane.b32.xlu1 %v625_v62, %s759_s30 }
 0x1fd   :  { %v226_v63 = vpop.permute.xlu2 %225 }
 0x1fe   :  { %v840_v3 = vmul.f32 0.35355338, %v226_v63 }
 0x205   :  { %v228_v1 = vpop.permute.xlu2 %227 }
 0x206   :  { %v842_v4 = vmul.f32 0.35355338, %v228_v1  ;;  %v266_v5 = vpack.c.bf16 %v228_v1, %v226_v63  ;;  %v67_v1 = vand.u32 4294967288, %v57_v56 }
 0x208   :  { %v262_v6 = vpack.c.bf16 %v842_v4, %v840_v3  ;;  %277 = vrot.lane.b32.xlu2 %v266_v5, %s762_s6  ;;  %v85_v3 = vand.u32 7, %v57_v56  ;;  %v65_v4 = vand.u32 4294967288, %v55_v61  ;;  %v83_v5 = vand.u32 7, %v55_v61 }
 0x209   :  { %vm910_vm4 = vcmp.eq.s32.totalorder %v67_v1, %v865_v43 }
 0x20a   :  { %vm915_vm5 = vcmp.le.s32.totalorder %v867_v44, %v85_v3  ;;  %vm921_vm6 = vcmp.eq.s32.totalorder %v65_v4, %v865_v43  ;;  %vm926_vm7 = vcmp.le.s32.totalorder %v867_v44, %v83_v5 }
 0x20b   :  { %vm101_vm9 = vmand %vm910_vm4, %vm915_vm5 }
 0x20c   :  { %vm99_vm10 = vmand %vm921_vm6, %vm926_vm7  ;;  %vm540_vm6 = vcmask 195584  }
 0x20d   :  { %v214_v7 = vpop.permute.xlu2 %213 }
 0x20e   :  { %v253_v34 = vmul.f32 0.35355338, %v214_v7 }
 0x215   :  { %v216_v8 = vpop.permute.xlu2 %215  ;;  %v220_v10 = vpop.permute.xlu0 %219 }
 0x216   :  { %v264_v9 = vpack.c.bf16 %v216_v8, %v214_v7  ;;  %v255_v31 = vmul.f32 0.35355338, %v220_v10  ;;  %v254_v33 = vmul.f32 0.35355338, %v216_v8  ;;  %v58_v7 = vadd.s32 48, %v52_v37 }
 0x218   :  { %273 = vrot.lane.b32.xlu2 %v264_v9, %s762_s6  ;;  %v260_v35 = vpack.c.bf16 %v254_v33, %v253_v34 }
 0x21d   :  { %v222_v11 = vpop.permute.xlu1 %221 }
 0x21e   :  { %v265_v12 = vpack.c.bf16 %v222_v11, %v220_v10  ;;  %v256_v29 = vmul.f32 0.35355338, %v222_v11 }
 0x220   :  { %275 = vrot.lane.b32.xlu0 %v265_v12, %s762_s6  ;;  %v261_v32 = vpack.c.bf16 %v256_v29, %v255_v31  ;;  %v59_v12 = vadd.s32 56, %v52_v37 }
 0x225   :  { %v272_v15 = vpop.permute.xlu1 %271 }
 0x226   :  { %v293_v27 = vsel %vm279_vm8, %v272_v15, 0 }
 0x228   :  { %621 = vrot.lane.b32.xlu0 %v625_v62, %s760_s5 }
 0x22d   :  { %v627_v22 = vpop.permute.xlu1 %626 }
 0x22e   :  { %v628_v24 = vunpack.i.l.bf16 %v627_v22  ;;  %v629_v25 = vunpack.i.h.bf16 %v627_v22 }
 0x230   :  { %631 = vrot.lane.b32.xlu0 %v625_v62, %s761_s3 }
 0x262   :  { %v278_v13 = vpop.permute.xlu2 %277 }
 0x263   :  { %v302_v14 = vsel %vm279_vm8, %v278_v13, 0 }
 0x264   :  { %308 = vmatpush.bf16.xpose.msra.mxu1 %v302_v14  ;;  %593 = vmatpush.bf16.xpose.msra.mxu3 %v302_v14 }
 0x272   :  { %v274_v18 = vpop.permute.xlu2 %273 }
 0x273   :  { %v296_v20 = vsel %vm279_vm8, %v274_v18, 0  ;;  %v68_v18 = vand.u32 4294967288, %v58_v7 }
 0x292   :  { %v276_v16 = vpop.permute.xlu0 %275 }
 0x293   :  { %v299_v17 = vsel %vm279_vm8, %v276_v16, 0 }
 0x294   :  { %309 = vmatpush.bf16.xpose.msra.mxu1 %v299_v17  ;;  %594 = vmatpush.bf16.xpose.msra.mxu3 %v299_v17 }
 0x29a   :  { %v622_v19 = vpop.permute.xlu0 %621 }
 0x29b   :  { %v623_v21 = vunpack.i.l.bf16 %v622_v19  ;;  %v624_v23 = vunpack.i.h.bf16 %v622_v19  ;;  %v86_v19 = vand.u32 7, %v58_v7 }
 0x29c   :  { %310 = vmatpush.bf16.xpose.msra.mxu1 %v296_v20  ;;  %595 = vmatpush.bf16.xpose.msra.mxu3 %v296_v20  ;;  %v69_v20 = vand.u32 4294967288, %v59_v12 }
 0x29d   :  { %470 = vmatpush.msrb.mxu0 %v623_v21  ;;  %597 = vmatpush.msra.mxu2 %v623_v21  ;;  %v87_v21 = vand.u32 7, %v59_v12  ;;  %vm948_vm12 = vcmp.le.s32.totalorder %v867_v44, %v86_v19 }
 0x29e   :  { %vm78_vm13 = vcmp.eq.s32.totalorder %v69_v20, %v865_v43 }
 0x29f   :  { %471 = vmatpush.msrb.mxu0 %v624_v23  ;;  %598 = vmatpush.msra.mxu2 %v624_v23 }
 0x2a1   :  { %472 = vmatpush.msrb.mxu0 %v628_v24  ;;  %599 = vmatpush.msra.mxu2 %v628_v24 }
 0x2a2   :  { %v632_v26 = vpop.permute.xlu0 %631 }
 0x2a3   :  { %473 = vmatpush.msrb.mxu0 %v629_v25  ;;  %600 = vmatpush.msra.mxu2 %v629_v25  ;;  %v633_v28 = vunpack.i.l.bf16 %v632_v26  ;;  %v634_v30 = vunpack.i.h.bf16 %v632_v26  ;;  %v53_v26 = vadd.s32 8, %v52_v37 }
 0x2a4   :  { %311 = vmatpush.bf16.xpose.msra.mxu1 %v293_v27  ;;  %596 = vmatpush.bf16.xpose.msra.mxu3 %v293_v27 }
 0x2a5   :  { %474 = vmatpush.msrb.mxu0 %v633_v28  ;;  %601 = vmatpush.msra.mxu2 %v633_v28  ;;  %v81_v33 = vand.u32 7, %v53_v26 }
 0x2a7   :  { %475 = vmatpush.msrb.mxu0 %v634_v30  ;;  %602 = vmatpush.msra.mxu2 %v634_v30  ;;  %vm89_vm4 = vcmp.le.s32.totalorder %v867_v44, %v81_v33 }
 0x2a9   :  { %476 = vmatpush.msrb.mxu0 %v822_v51  ;;  %603 = vmatpush.msra.mxu2 %v822_v51  ;;  %v763_v51 = vmov -1e+30  }
 0x2aa   :  { %v108_v52 = vsel %vm100_vm11, 0.0, %v763_v51  ;;  %v104_v63 = vsel %vm96_vm14, 0.0, %v763_v51  ;;  %v106_v11 = vsel %vm98_vm3, 0.0, %v763_v51  ;;  %v109_v23 = vsel %vm101_vm9, 0.0, %v763_v51 }
 0x2ab   :  { %579 = vmatmul.msk.bf16.vlgmr.msra.gmra.mxu1 %vm279_vm8, %v259_v60  ;;  %581 = vmatmul.msk.bf16.vlgmr.msra.gmra.mxu3 %vm279_vm8, %v261_v32  ;;  %vm943_vm11 = vcmp.eq.s32.totalorder %v68_v18, %v865_v43  ;;  %v107_v28 = vsel %vm99_vm10, 0.0, %v763_v51  ;;  %vm95_vm14 = vcmp.le.s32.totalorder %v867_v44, %v87_v21  ;;  %v63_v32 = vand.u32 4294967288, %v53_v26 }
 0x2ac   :  { %477 = vmatpush.msrb.mxu0 %v820_v50  ;;  %604 = vmatpush.msra.mxu2 %v820_v50  ;;  %vm102_vm1 = vmand %vm943_vm11, %vm948_vm12 }
 0x2ad   :  { %vm103_vm2 = vmand %vm78_vm13, %vm95_vm14  ;;  %v110_v36 = vsel %vm102_vm1, 0.0, %v763_v51  ;;  %vm72_vm3 = vcmp.eq.s32.totalorder %v63_v32, %v865_v43 }
 0x2ae   :  { %v111_v37 = vsel %vm103_vm2, 0.0, %v763_v51  ;;  %vm97_vm5 = vmand %vm72_vm3, %vm89_vm4 }
 0x2af   :  { %v105_v46 = vsel %vm97_vm5, 0.0, %v763_v51 }
 0x2bb   :  { %580 = vmatmul.msk.bf16.gmra.mxu1 %vm279_vm8, %v260_v35  ;;  %582 = vmatmul.msk.bf16.gmra.mxu3 %vm279_vm8, %v262_v6 }
 0x328   :  { %v313_v47 = vpop.f32.mrf.mxu1 }
 0x329   :  { %v907_v6 = vadd.f32 %v313_v47, %v104_v63 }
 0x32b   :  { %v334_v17 = vsel %vm333_vm15, %v907_v6, -inf }
 0x32e   :  { %v323_v55 = vpop.f32.mrf.mxu3 }
 0x32f   :  { %v886_v57 = vadd.f32 %v323_v55, %v108_v52 }
 0x330   :  { %v888_v58 = vpop.f32.mrf.mxu1 }
 0x331   :  { %v346_v62 = vsel %vm333_vm15, %v886_v57, -inf  ;;  %v316_v47 = vadd.f32 %v888_v58, %v105_v46 }
 0x332   :  { %347 = vmax.xlane.f32.xlu0 %v346_v62 }
 0x333   :  { %v337_v48 = vsel %vm333_vm15, %v316_v47, -inf }
 0x336   :  { %v325_v10 = vpop.f32.mrf.mxu3 }
 0x337   :  { %v326_v29 = vadd.f32 %v325_v10, %v109_v23 }
 0x338   :  { %v318_v13 = vpop.f32.mrf.mxu1 }
 0x339   :  { %v319_v16 = vadd.f32 %v318_v13, %v106_v11  ;;  %v349_v35 = vsel %vm333_vm15, %v326_v29, -inf }
 0x33a   :  { %335 = vmax.xlane.f32.xlu0 %v334_v17 }
 0x33b   :  { %v340_v22 = vsel %vm333_vm15, %v319_v16, -inf }
 0x33c   :  { %341 = vmax.xlane.f32.xlu2 %v340_v22 }
 0x33e   :  { %v328_v27 = vpop.f32.mrf.mxu3 }
 0x33f   :  { %v329_v40 = vadd.f32 %v328_v27, %v110_v36 }
 0x340   :  { %v320_v30 = vpop.f32.mrf.mxu1 }
 0x341   :  { %v321_v31 = vadd.f32 %v320_v30, %v107_v28  ;;  %v352_v45 = vsel %vm333_vm15, %v329_v40, -inf }
 0x343   :  { %v343_v34 = vsel %vm333_vm15, %v321_v31, -inf }
 0x344   :  { %344 = vmax.xlane.f32.xlu1 %v343_v34  ;;  %350 = vmax.xlane.f32.xlu2 %v349_v35 }
 0x346   :  { %v330_v39 = vpop.f32.mrf.mxu3 }
 0x347   :  { %v331_v41 = vadd.f32 %v330_v39, %v111_v37 }
 0x349   :  { %v355_v42 = vsel %vm333_vm15, %v331_v41, -inf }
 0x34c   :  { %356 = vmax.xlane.f32.xlu1 %v355_v42  ;;  %353 = vmax.xlane.f32.xlu2 %v352_v45 }
 0x354   :  { %338 = vmax.xlane.f32.xlu2 %v337_v48 }
 0x3a5   :  { %v348_v43 = vpop.xlane.xlu0 %347 }
 0x3a6   :  { %v362_v44 = vsub.f32 %v886_v57, %v348_v43 }
 0x3a8   :  { %v374_v49 = vmul.f32 1.442695, %v362_v44 }
 0x3aa   :  { %642 = vpow2.f32 %v374_v49 }
 0x3ad   :  { %v336_v50 = vpop.xlane.xlu0 %335 }
 0x3ae   :  { %v358_v52 = vsub.f32 %v907_v6, %v336_v50 }
 0x3af   :  { %v342_v53 = vpop.xlane.xlu2 %341 }
 0x3b0   :  { %v643_v54 = vpop.eup %642  ;;  %v366_v55 = vmul.f32 1.442695, %v358_v52  ;;  %v360_v56 = vsub.f32 %v319_v16, %v342_v53 }
 0x3b1   :  { %v394_v51 = vsel %vm333_vm15, %v643_v54, 0.0 }
 0x3b2   :  { %644 = vpow2.f32 %v366_v55  ;;  %v370_v59 = vmul.f32 1.442695, %v360_v56  ;;  %395 = vadd.xlane.f32.xlu2 %v394_v51 }
 0x3b4   :  { %646 = vpow2.f32 %v370_v59 }
 0x3b7   :  { %v345_v58 = vpop.xlane.xlu1 %344  ;;  %v351_v60 = vpop.xlane.xlu2 %350 }
 0x3b8   :  { %v645_v61 = vpop.eup %644  ;;  %v361_v62 = vsub.f32 %v321_v31, %v345_v58  ;;  %v363_v57 = vsub.f32 %v326_v29, %v351_v60 }
 0x3b9   :  { %583 = vmatmul.msk.f32.vlgmr.msrb.gmra.mxu0 %vm333_vm15, %v645_v61  ;;  %v382_v23 = vsel %vm333_vm15, %v645_v61, 0.0 }
 0x3ba   :  { %v647_v63 = vpop.eup %646  ;;  %v372_v1 = vmul.f32 1.442695, %v361_v62  ;;  %v376_v3 = vmul.f32 1.442695, %v363_v57 }
 0x3bb   :  { %585 = vmatmul.msk.f32.vlgmr.msra.gmra.mxu2 %vm333_vm15, %v647_v63  ;;  %v388_v19 = vsel %vm333_vm15, %v647_v63, 0.0 }
 0x3bc   :  { %648 = vpow2.f32 %v372_v1 }
 0x3bd   :  { %650 = vpow2.f32 %v376_v3 }
 0x3bf   :  { %v357_v4 = vpop.xlane.xlu1 %356  ;;  %v354_v5 = vpop.xlane.xlu2 %353 }
 0x3c0   :  { %v365_v6 = vsub.f32 %v331_v41, %v357_v4  ;;  %v364_v7 = vsub.f32 %v329_v40, %v354_v5 }
 0x3c2   :  { %v649_v8 = vpop.eup %648  ;;  %v380_v9 = vmul.f32 1.442695, %v365_v6  ;;  %v378_v10 = vmul.f32 1.442695, %v364_v7 }
 0x3c3   :  { %v651_v11 = vpop.eup %650  ;;  %586 = vmatmul.msk.f32.gmra.mxu2 %vm333_vm15, %v649_v8  ;;  %v391_v22 = vsel %vm333_vm15, %v649_v8, 0.0 }
 0x3c4   :  { %652 = vpow2.f32 %v380_v9  ;;  %v397_v12 = vsel %vm333_vm15, %v651_v11, 0.0 }
 0x3c5   :  { %654 = vpow2.f32 %v378_v10  ;;  %398 = vadd.xlane.f32.xlu1 %v397_v12 }
 0x3c7   :  { %v339_v13 = vpop.xlane.xlu2 %338 }
 0x3c8   :  { %v359_v14 = vsub.f32 %v316_v47, %v339_v13 }
 0x3ca   :  { %v653_v15 = vpop.eup %652  ;;  %v368_v16 = vmul.f32 1.442695, %v359_v14 }
 0x3cb   :  { %v655_v17 = vpop.eup %654  ;;  %587 = vmatmul.msk.f32.gmra.mxu2 %vm333_vm15, %v643_v54  ;;  %v403_v18 = vsel %vm333_vm15, %v653_v15, 0.0 }
 0x3cc   :  { %656 = vpow2.f32 %v368_v16  ;;  %404 = vadd.xlane.f32.xlu2 %v403_v18  ;;  %v400_v20 = vsel %vm333_vm15, %v655_v17, 0.0 }
 0x3cd   :  { %389 = vadd.xlane.f32.xlu1 %v388_v19  ;;  %401 = vadd.xlane.f32.xlu0 %v400_v20 }
 0x3d2   :  { %v657_v21 = vpop.eup %656 }
 0x3d3   :  { %584 = vmatmul.msk.f32.gmra.mxu0 %vm333_vm15, %v657_v21  ;;  %588 = vmatmul.msk.f32.gmra.mxu2 %vm333_vm15, %v651_v11  ;;  %v385_v24 = vsel %vm333_vm15, %v657_v21, 0.0 }
 0x3d5   :  { %392 = vadd.xlane.f32.xlu0 %v391_v22  ;;  %383 = vadd.xlane.f32.xlu1 %v382_v23  ;;  %v545_v23 = vperm.slane %v816_v38, 2 }
 0x3db   :  { %589 = vmatmul.msk.f32.gmra.mxu2 %vm333_vm15, %v655_v17 }
 0x3dd   :  { %386 = vadd.xlane.f32.xlu0 %v385_v24 }
 0x3e3   :  { %590 = vmatmul.msk.f32.gmra.mxu2 %vm333_vm15, %v653_v15  ;;  %vm537_vm15 = vcmask 130048  }
 0x425   :  { %v396_v26 = vpop.xlane.xlu2 %395 }
 0x426   :  { %658 = vrcp.f32 %v396_v26 }
 0x42c   :  { %v659_v30 = vpop.eup %658 }
 0x42d   :  { %v418_v31 = vmul.f32 %v659_v30, %v396_v26 }
 0x42f   :  { %v426_v36 = vsub.f32 2.0, %v418_v31 }
 0x431   :  { %v434_v42 = vmul.f32 %v659_v30, %v426_v36 }
 0x436   :  { %v479_v15 = vpop.f32.mrf.mxu0 }
 0x438   :  { %v399_v25 = vpop.xlane.xlu1 %398 }
 0x43e   :  { %v485_v27 = vpop.f32.mrf.mxu2 }
 0x43f   :  { %v405_v44 = vpop.xlane.xlu2 %404 }
 0x440   :  { %v390_v28 = vpop.xlane.xlu1 %389  ;;  %v402_v29 = vpop.xlane.xlu0 %401 }
 0x441   :  { %660 = vrcp.f32 %v390_v28 }
 0x442   :  { %662 = vrcp.f32 %v399_v25 }
 0x446   :  { %v488_v32 = vpop.f32.mrf.mxu2 }
 0x447   :  { %v661_v33 = vpop.eup %660 }
 0x448   :  { %v416_v34 = vmul.f32 %v661_v33, %v390_v28  ;;  %v393_v35 = vpop.xlane.xlu0 %392  ;;  %v663_v37 = vpop.eup %662 }
 0x449   :  { %664 = vrcp.f32 %v393_v35  ;;  %v419_v41 = vmul.f32 %v663_v37, %v399_v25  ;;  %v384_v6 = vpop.xlane.xlu1 %383 }
 0x44a   :  { %v424_v39 = vsub.f32 2.0, %v416_v34  ;;  %666 = vrcp.f32 %v402_v29 }
 0x44b   :  { %v427_v43 = vsub.f32 2.0, %v419_v41  ;;  %668 = vrcp.f32 %v405_v44 }
 0x44c   :  { %v432_v40 = vmul.f32 %v661_v33, %v424_v39  ;;  %670 = vrcp.f32 %v384_v6 }
 0x44d   :  { %v435_v54 = vmul.f32 %v663_v37, %v427_v43 }
 0x44e   :  { %v491_v45 = vpop.f32.mrf.mxu2  ;;  %v505_v46 = vmul.f32 %v485_v27, %v432_v40 }
 0x44f   :  { %v507_v47 = vmul.f32 %v491_v45, %v434_v42  ;;  %v665_v48 = vpop.eup %664 }
 0x450   :  { %513 = vrot.lane.b32.xlu2 %v505_v46, %s754_s24  ;;  %v417_v49 = vmul.f32 %v665_v48, %v393_v35  ;;  %v667_v50 = vpop.eup %666  ;;  %v387_v7 = vpop.xlane.xlu0 %386 }
 0x451   :  { %521 = vrot.lane.b32.xlu0 %v507_v47, %s764_s7  ;;  %v420_v53 = vmul.f32 %v667_v50, %v402_v29  ;;  %v669_v60 = vpop.eup %668  ;;  %672 = vrcp.f32 %v387_v7  ;;  %v482_v26 = vpop.f32.mrf.mxu0 }
 0x452   :  { %v425_v52 = vsub.f32 2.0, %v417_v49  ;;  %v421_v61 = vmul.f32 %v669_v60, %v405_v44  ;;  %v671_v8 = vpop.eup %670 }
 0x453   :  { %v428_v58 = vsub.f32 2.0, %v420_v53  ;;  %v414_v9 = vmul.f32 %v671_v8, %v384_v6 }
 0x454   :  { %v433_v55 = vmul.f32 %v665_v48, %v425_v52  ;;  %v429_v1 = vsub.f32 2.0, %v421_v61 }
 0x455   :  { %v436_v62 = vmul.f32 %v667_v50, %v428_v58  ;;  %v422_v11 = vsub.f32 2.0, %v414_v9 }
 0x456   :  { %v494_v56 = vpop.f32.mrf.mxu2  ;;  %v506_v59 = vmul.f32 %v488_v32, %v433_v55  ;;  %v437_v3 = vmul.f32 %v669_v60, %v429_v1 }
 0x457   :  { %v508_v51 = vmul.f32 %v494_v56, %v435_v54  ;;  %v673_v10 = vpop.eup %672  ;;  %v430_v14 = vmul.f32 %v671_v8, %v422_v11 }
 0x458   :  { %515 = vrot.lane.b32.xlu1 %v506_v59, %s754_s24  ;;  %v415_v12 = vmul.f32 %v673_v10, %v387_v7 }
 0x459   :  { %523 = vrot.lane.b32.xlu2 %v508_v51, %s764_s7  ;;  %v503_v18 = vmul.f32 %v479_v15, %v430_v14 }
 0x45a   :  { %v423_v16 = vsub.f32 2.0, %v415_v12 }
 0x45c   :  { %v431_v19 = vmul.f32 %v673_v10, %v423_v16 }
 0x45e   :  { %v497_v57 = vpop.f32.mrf.mxu2  ;;  %v504_v28 = vmul.f32 %v482_v26, %v431_v19 }
 0x45f   :  { %v509_v63 = vmul.f32 %v497_v57, %v436_v62 }
 0x461   :  { %529 = vrot.lane.b32.xlu0 %v509_v63, %s765_s8 }
 0x466   :  { %v500_v4 = vpop.f32.mrf.mxu2 }
 0x467   :  { %v510_v5 = vmul.f32 %v500_v4, %v437_v3 }
 0x469   :  { %531 = vrot.lane.b32.xlu1 %v510_v5, %s765_s8 }
 0x4aa   :  { %v514_v17 = vpop.permute.xlu2 %513 }
 0x4ab   :  { %v535_v20 = vsel %vm279_vm8, %v503_v18, %v514_v17 }
 0x4b3   :  { %v524_v31 = vpop.permute.xlu2 %523 }
 0x4c3   :  { %v522_v13 = vpop.permute.xlu0 %521 }
 0x4c4   :  { %v538_v21 = vsel %vm537_vm15, %v535_v20, %v522_v13 }
 0x4ca   :  { %v516_v22 = vpop.permute.xlu1 %515 }
 0x4cb   :  { %v536_v30 = vsel %vm279_vm8, %v504_v28, %v516_v22 }
 0x4cc   :  { %v539_v33 = vsel %vm537_vm15, %v536_v30, %v524_v31 }
 0x4d3   :  { %v530_v24 = vpop.permute.xlu0 %529 }
 0x4d4   :  { %v541_v25 = vsel %vm540_vm6, %v538_v21, %v530_v24 }
 0x4d5   :  { %v543_v27 = vadd.f32 %v541_v25, %v801_v0 }
 0x4d7   :  { %v546_v29 = vadd.f32 %v545_v23, %v543_v27 }
 0x4d9   :  { %548 = vst.msk [vmem:[#allocation7] sm:$0xff] %vm116_vm0, %v546_v29 }
 0x4db   :  { %v532_v32 = vpop.permute.xlu1 %531 }
 0x4dc   :  { %v542_v34 = vsel %vm540_vm6, %v539_v33, %v532_v32 }
 0x4dd   :  { %v544_v0 = vadd.f32 %v542_v34, %v805_v2 }
 0x4df   :  { %v547_v38 = vadd.f32 %v545_v23, %v544_v0 }
 0x4e1   :  { %549 = vst.msk [vmem:[#allocation7 + $0x8] sm:$0xff] %vm116_vm0, %v547_v38 }
 0x4e2   :  { %562 = dma.vmem_to_hbm [thread:$0]  %s555_s10, 256, %s557_s13, [#allocation4], %s753_s23, %s753_s23, %s754_s24  }
 0x4e3   :  { %750 = dma.done.wait [#allocation4], 256  }
 0x4e4   :  { %751 = vsyncadd [#allocation4], 4294967040 }
 0x4e5   :  { %567 = vsyncpa [#allocation3], 1 }
 0x4e6   :  { %568 = vsyncpa [#allocation6], 1 }
 0x4e7   :  { %569 = vsyncpa [#allocation4], 1 }

</bundles_post_ra>
